<compile_context>
chip_gen: v7x
topology: tpu7x:2x2x1
jax: 0.10.0
libtpu: 0.0.40
codegen_flags: <defaults>
</compile_context>

<pallas_src>
import functools
import math

import jax
import jax.numpy as jnp
from jax.experimental import pallas as pl
from jax.experimental.pallas import tpu as pltpu


def _pick_q_tile(n):
    """Largest convenient query tile (multiple of 8, or the full sequence)."""
    if n <= 256:
        return n
    for tq in (256, 128, 64, 32, 16, 8):
        if n % tq == 0:
            return tq
    return n


def _vmem_limit_bytes():
    """3/4 of physical VMEM (stays under 64 MiB on v7x, under 128 MiB on v5e/v6e)."""
    cap = 64 * 1024 * 1024
    try:
        cap = int(pltpu.get_tpu_info().vmem_capacity_bytes)
    except Exception:
        pass
    return int(cap * 3 // 4)


def _fused_attention_kernel(x_ref, wqkv_ref, wproj_ref, bproj_ref, o_ref,
                            kv_scratch, attn_scratch, *, num_heads, scale, q_tile):
    # x_ref:        (1, N, C)   bf16 (full sequence of one batch row)
    # wqkv_ref:     (C, 3C)     bf16 (resident, single-buffered)
    # wproj_ref:    (C, C)      bf16 (resident, single-buffered)
    # bproj_ref:    (1, C)      f32
    # o_ref:        (1, TQ, C)  output dtype
    # kv_scratch:   (N, 2C)     bf16  K|V packed, resident across the q-tile axis
    # attn_scratch: (TQ, C)     bf16  per-head outputs packed along C
    qi = pl.program_id(1)
    N = x_ref.shape[1]
    C = o_ref.shape[2]
    D = C // num_heads

    # K/V projection over the full sequence: computed once per batch row (q-tile 0).
    @pl.when(qi == 0)
    def _():
        kv = jnp.dot(x_ref[0], wqkv_ref[:, C:],
                     preferred_element_type=jnp.float32)               # (N, 2C)
        kv_scratch[...] = kv.astype(kv_scratch.dtype)

    # Q projection for the current query tile only (scale folded in once).
    q_start = pl.multiple_of(qi * q_tile, q_tile)
    x_tile = x_ref[0, pl.ds(q_start, q_tile), :]                       # (TQ, C) bf16
    q = jnp.dot(x_tile, wqkv_ref[:, :C],
                preferred_element_type=jnp.float32) * scale            # (TQ, C) f32
    q = q.astype(jnp.bfloat16)

    # Per-head attention.  Static unroll keeps all lane slices static (num_heads is
    # small); per-head results land in attn_scratch so no value accumulator stays
    # live across heads.
    # NOTE: if head_dim is not 128-aligned (e.g. 72), these lane slices cross
    # (8,128) tile boundaries and Mosaic inserts relayout copies; a D-padded qkv
    # layout would remove them.
    for h in range(num_heads):
        lo, hi = h * D, (h + 1) * D
        qh = q[:, lo:hi]                                               # (TQ, D) bf16
        kh = kv_scratch[:, lo:hi]                                      # (N, D)  bf16
        vh = kv_scratch[:, C + lo:C + hi]                              # (N, D)  bf16
        # s = qh @ kh.T  (contract last dims; no explicit transpose)
        s = jax.lax.dot_general(qh, kh, (((1,), (1,)), ((), ())),
                                preferred_element_type=jnp.float32)    # (TQ, N) f32
        s = s - jnp.max(s, axis=-1, keepdims=True)
        p = jnp.exp(s)                                                 # f32 stats
        l = jnp.sum(p, axis=-1, keepdims=True)                         # (TQ, 1) f32
        oh = jnp.dot(p.astype(jnp.bfloat16), vh,
                     preferred_element_type=jnp.float32)               # (TQ, D) f32
        oh = oh * pl.reciprocal(l, approx=True)                        # EUP, not VPU divide
        attn_scratch[:, lo:hi] = oh.astype(attn_scratch.dtype)

    # Single full-depth (K=C) output projection.
    out = jnp.dot(attn_scratch[...], wproj_ref[...],
                  preferred_element_type=jnp.float32) + bproj_ref[...]
    o_ref[0] = out.astype(o_ref.dtype)


def attention_projection(x, wqkv, wproj, bproj, *, num_heads):
    """Fused qkv -> multi-head SDPA -> proj. x: (B, N, C) -> (B, N, C)."""
    B, N, C = x.shape
    assert C % num_heads == 0
    D = C // num_heads
    scale = float(D) ** -0.5
    out_dtype = x.dtype

    TQ = _pick_q_tile(N)
    num_q_tiles = N // TQ

    # bf16 MXU operands (f32 accumulation inside the kernel).
    x_b = x.astype(jnp.bfloat16)
    wqkv_b = wqkv.astype(jnp.bfloat16)
    wproj_b = wproj.astype(jnp.bfloat16)
    bproj_f = bproj.astype(jnp.float32).reshape(1, C)

    kernel = functools.partial(_fused_attention_kernel,
                               num_heads=num_heads, scale=scale, q_tile=TQ)

    flops = B * (2 * N * C * 3 * C + 4 * N * N * C + 2 * N * C * C)
    transcendentals = B * num_heads * N * N
    bytes_accessed = (x_b.size * 2 + wqkv_b.size * 2 + wproj_b.size * 2
                      + bproj_f.size * 4
                      + B * N * C * jnp.dtype(out_dtype).itemsize)

    grid_spec = pltpu.PrefetchScalarGridSpec(
        num_scalar_prefetch=0,
        grid=(B, num_q_tiles),
        in_specs=[
            # full sequence of one batch row (constant along the q-tile axis)
            pl.BlockSpec((1, N, C), lambda b, qi: (b, 0, 0)),
            # resident weights / bias: constant index_map -> single-buffered
            pl.BlockSpec((C, 3 * C), lambda b, qi: (0, 0),
                         pipeline_mode=pl.Buffered(1)),
            pl.BlockSpec((C, C), lambda b, qi: (0, 0),
                         pipeline_mode=pl.Buffered(1)),
            pl.BlockSpec((1, C), lambda b, qi: (0, 0),
                         pipeline_mode=pl.Buffered(1)),
        ],
        out_specs=pl.BlockSpec((1, TQ, C), lambda b, qi: (b, qi, 0)),  # lane-dense along C
        scratch_shapes=[
            pltpu.VMEM((N, 2 * C), jnp.bfloat16),   # K|V, resident across q tiles
            pltpu.VMEM((TQ, C), jnp.bfloat16),      # packed per-head outputs
        ],
    )

    return pl.pallas_call(
        kernel,
        out_shape=jax.ShapeDtypeStruct((B, N, C), out_dtype),
        grid_spec=grid_spec,
        compiler_params=pltpu.CompilerParams(
            dimension_semantics=("parallel", "arbitrary"),
            vmem_limit_bytes=_vmem_limit_bytes(),
        ),
        cost_estimate=pl.CostEstimate(flops=flops,
                                      transcendentals=transcendentals,
                                      bytes_accessed=bytes_accessed),
    )(x_b, wqkv_b, wproj_b, bproj_f)


def attention_forward(x, static_var, wqkv, wproj, bproj, *, num_heads, image_time_length):
    """Full module forward: fused attention kernel + temporal rearrange glue."""
    B, N, C = x.shape
    t = image_time_length
    b = B // t
    hn = int(math.isqrt(N))

    x_proj = attention_projection(x, wqkv, wproj, bproj, num_heads=num_heads)

    # rearrange '(b t) (h w) c -> b c t h w'
    out = x_proj.reshape(b, t, hn, hn, C).transpose(0, 4, 1, 2, 3)       # (b, c, t, h, w)
    # rearrange static_var 'b (h w) c -> b c h w' and prepend as frame 0
    sv = static_var.reshape(b, hn, hn, C).transpose(0, 3, 1, 2)          # (b, c, h, w)
    out = jnp.concatenate([sv[:, :, None, :, :], out], axis=2)           # (b, c, t+1, h, w)
    # TODO(synk): temporal_transformer_block (get_motion_module_layer) has no definition in
    # the provided spec (external motion-module dependency); treated as identity here.
    out = out[:, :, 1:, :, :]
    # rearrange 'b c t h w -> (b t) (h w) c'
    out = out.transpose(0, 2, 3, 4, 1).reshape(b * t, hn * hn, C)
    return out + x_proj                                                  # residual


def reference_forward(x, static_var, wqkv, wproj, bproj, *, num_heads, image_time_length):
    """Pure-JAX f32 reference matching the PyTorch module (temporal block = identity)."""
    B, N, C = x.shape
    D = C // num_heads
    scale = float(D) ** -0.5

    qkv = x @ wqkv                                                        # (B, N, 3C)
    qkv = qkv.reshape(B, N, 3, num_heads, D).transpose(2, 0, 3, 1, 4)     # (3, B, H, N, D)
    q, k, v = qkv[0], qkv[1], qkv[2]
    s = jnp.einsum('bhqd,bhkd->bhqk', q * scale, k)
    s = s - jnp.max(s, axis=-1, keepdims=True)
    p = jnp.exp(s)
    p = p / jnp.sum(p, axis=-1, keepdims=True)
    o = jnp.einsum('bhqk,bhkd->bhqd', p, v)
    o = o.transpose(0, 2, 1, 3).reshape(B, N, C)
    x_proj = o @ wproj + bproj

    t = image_time_length
    b = B // t
    hn = int(math.isqrt(N))
    out = x_proj.reshape(b, t, hn, hn, C).transpose(0, 4, 1, 2, 3)
    sv = static_var.reshape(b, hn, hn, C).transpose(0, 3, 1, 2)
    out = jnp.concatenate([sv[:, :, None, :, :], out], axis=2)
    out = out[:, :, 1:, :, :]
    out = out.transpose(0, 2, 3, 4, 1).reshape(b * t, hn * hn, C)
    return out + x_proj


if __name__ == "__main__":
    # Small shapes consistent with the module:
    #   b=2 videos, image_time_length t=2  ->  B = b*t = 4 frames
    #   N = 16 spatial tokens (4x4), dim C = 32, num_heads = 4 (head_dim = 8)
    b, t = 2, 2
    B = b * t
    N, C, NUM_HEADS = 16, 32, 4

    key = jax.random.PRNGKey(0)
    kx, ks, k1, k2, k3 = jax.random.split(key, 5)
    x = jax.random.normal(kx, (B, N, C), dtype=jnp.float32)
    static_var = jax.random.normal(ks, (b, N, C), dtype=jnp.float32)

    # nn.Linear-style init: U(-1/sqrt(fan_in), 1/sqrt(fan_in)); qkv has no bias.
    lim = 1.0 / math.sqrt(C)
    wqkv = jax.random.uniform(k1, (C, 3 * C), jnp.float32, -lim, lim)
    wproj = jax.random.uniform(k2, (C, C), jnp.float32, -lim, lim)
    bproj = jax.random.uniform(k3, (1, C), jnp.float32, -lim, lim)

    out = attention_forward(x, static_var, wqkv, wproj, bproj,
                            num_heads=NUM_HEADS, image_time_length=t)
    out = jax.block_until_ready(out)

    ref = reference_forward(x, static_var, wqkv, wproj, bproj,
                            num_heads=NUM_HEADS, image_time_length=t)
    assert out.shape == (B, N, C), out.shape
    # bf16 MXU operands + approx reciprocal -> relaxed tolerance vs the f32 reference.
    assert jnp.allclose(out, ref, atol=5e-2, rtol=5e-2), float(jnp.max(jnp.abs(out - ref)))

    print("KERNEL_OK")
</pallas_src>

<mosaic_0001>
module attributes {stable_mosaic.version = 11 : i64} {
  func.func @_fused_attention_kernel(%arg0: i32, %arg1: i32, %arg2: memref<1x16x32xbf16, #tpu.memory_space<vmem>>, %arg3: memref<32x96xbf16, #tpu.memory_space<vmem>>, %arg4: memref<32x32xbf16, #tpu.memory_space<vmem>>, %arg5: memref<1x32xf32, #tpu.memory_space<vmem>>, %arg6: memref<1x16x32xf32, #tpu.memory_space<vmem>>, %arg7: memref<16x64xbf16, #tpu.memory_space<vmem>>, %arg8: memref<16x32xbf16, #tpu.memory_space<vmem>>) attributes {dimension_semantics = [#tpu.dimension_semantics<parallel>, #tpu.dimension_semantics<arbitrary>], iteration_bounds = array<i64: 4, 1>, scalar_prefetch = 0 : i64, scratch_operands = 2 : i64, tpu.core_type = #tpu.core_type<tc>, window_params = [{transform_indices = @transform_0, window_bounds = array<i64: 1, 16, 32>}, {pipeline_mode = #tpu.pipeline_mode<synchronous>, transform_indices = @transform_1, window_bounds = array<i64: 32, 96>}, {pipeline_mode = #tpu.pipeline_mode<synchronous>, transform_indices = @transform_2, window_bounds = array<i64: 32, 32>}, {pipeline_mode = #tpu.pipeline_mode<synchronous>, transform_indices = @transform_3, window_bounds = array<i64: 1, 32>}, {transform_indices = @transform_4, window_bounds = array<i64: 1, 16, 32>}]} {
    %c0_i32 = arith.constant 0 : i32
    %0 = arith.cmpi eq, %arg1, %c0_i32 : i32
    %1 = arith.extui %0 : i1 to i32
    %c0_i32_0 = arith.constant 0 : i32
    %2 = arith.cmpi ne, %1, %c0_i32_0 : i32
    scf.if %2 {
      %c0_48 = arith.constant 0 : index
      %c0_49 = arith.constant 0 : index
      %c0_50 = arith.constant 0 : index
      %94 = vector.load %arg2[%c0_48, %c0_49, %c0_50] : memref<1x16x32xbf16, #tpu.memory_space<vmem>>, vector<1x16x32xbf16>
      %95 = vector.shape_cast %94 : vector<1x16x32xbf16> to vector<16x32xbf16>
      %c0_51 = arith.constant 0 : index
      %c32_52 = arith.constant 32 : index
      %96 = vector.load %arg3[%c0_51, %c32_52] : memref<32x96xbf16, #tpu.memory_space<vmem>>, vector<32x64xbf16>
      %cst_53 = arith.constant dense<0.000000e+00> : vector<16x64xf32>
      %97 = tpu.matmul %95, %96, %cst_53 {dimension_numbers = #tpu.dot_dimension_numbers<[1], [0], [0], [1], [0, 0, 1, 1], [], []>} : vector<16x32xbf16>, vector<32x64xbf16>, vector<16x64xf32> -> vector<16x64xf32>
      %98 = arith.truncf %97 : vector<16x64xf32> to vector<16x64xbf16>
      %c0_54 = arith.constant 0 : index
      %c0_55 = arith.constant 0 : index
      %99 = vector.load %arg7[%c0_54, %c0_55] : memref<16x64xbf16, #tpu.memory_space<vmem>>, vector<16x64xbf16>
      tpu.vector_store %arg7[%c0_54, %c0_55], %98 {strides = array<i32>} : memref<16x64xbf16, #tpu.memory_space<vmem>>, vector<16x64xbf16>,
    } else {
    }
    %c16_i32 = arith.constant 16 : i32
    %3 = arith.muli %arg1, %c16_i32 : i32
    %4 = tpu.assume_multiple %3, 16 : i32
    %c0 = arith.constant 0 : index
    %5 = arith.index_cast %4 : i32 to index
    %c0_1 = arith.constant 0 : index
    %6 = vector.load %arg2[%c0, %5, %c0_1] : memref<1x16x32xbf16, #tpu.memory_space<vmem>>, vector<1x16x32xbf16>
    %7 = vector.shape_cast %6 : vector<1x16x32xbf16> to vector<16x32xbf16>
    %c0_2 = arith.constant 0 : index
    %c0_3 = arith.constant 0 : index
    %8 = vector.load %arg3[%c0_2, %c0_3] : memref<32x96xbf16, #tpu.memory_space<vmem>>, vector<32x32xbf16>
    %cst = arith.constant dense<0.000000e+00> : vector<16x32xf32>
    %9 = tpu.matmul %7, %8, %cst {dimension_numbers = #tpu.dot_dimension_numbers<[1], [0], [0], [1], [0, 0, 1, 1], [], []>} : vector<16x32xbf16>, vector<32x32xbf16>, vector<16x32xf32> -> vector<16x32xf32>
    %cst_4 = arith.constant 0.353553385 : f32
    %10 = vector.broadcast %cst_4 : f32 to vector<16x32xf32>
    %11 = arith.mulf %9, %10 : vector<16x32xf32>
    %12 = arith.truncf %11 : vector<16x32xf32> to vector<16x32xbf16>
    %13 = vector.extract_strided_slice %12 {offsets = [0, 0], sizes = [16, 8], strides = [1, 1]} : vector<16x32xbf16> to vector<16x8xbf16>
    %c0_5 = arith.constant 0 : index
    %c0_6 = arith.constant 0 : index
    %14 = vector.load %arg7[%c0_5, %c0_6] : memref<16x64xbf16, #tpu.memory_space<vmem>>, vector<16x8xbf16>
    %c0_7 = arith.constant 0 : index
    %c32 = arith.constant 32 : index
    %15 = vector.load %arg7[%c0_7, %c32] : memref<16x64xbf16, #tpu.memory_space<vmem>>, vector<16x8xbf16>
    %cst_8 = arith.constant dense<0.000000e+00> : vector<16x16xf32>
    %16 = tpu.matmul %13, %14, %cst_8 {dimension_numbers = #tpu.dot_dimension_numbers<[1], [1], [0], [0], [0, 0, 1, 0], [], []>} : vector<16x8xbf16>, vector<16x8xbf16>, vector<16x16xf32> -> vector<16x16xf32>
    %cst_9 = arith.constant dense<0xFF800000> : vector<16xf32>
    %17 = vector.multi_reduction <maximumf>, %16, %cst_9 [1] : vector<16x16xf32> to vector<16xf32>
    %18 = vector.shape_cast %17 : vector<16xf32> to vector<16x1xf32>
    %19 = vector.broadcast %18 : vector<16x1xf32> to vector<16x16xf32>
    %20 = arith.subf %16, %19 : vector<16x16xf32>
    %21 = math.exp %20 : vector<16x16xf32>
    %cst_10 = arith.constant dense<0.000000e+00> : vector<16xf32>
    %22 = vector.multi_reduction <add>, %21, %cst_10 [1] : vector<16x16xf32> to vector<16xf32>
    %23 = vector.shape_cast %22 : vector<16xf32> to vector<16x1xf32>
    %24 = arith.truncf %21 : vector<16x16xf32> to vector<16x16xbf16>
    %cst_11 = arith.constant dense<0.000000e+00> : vector<16x8xf32>
    %25 = tpu.matmul %24, %15, %cst_11 {dimension_numbers = #tpu.dot_dimension_numbers<[1], [0], [0], [1], [0, 0, 1, 1], [], []>} : vector<16x16xbf16>, vector<16x8xbf16>, vector<16x8xf32> -> vector<16x8xf32>
    %26 = tpu.reciprocal %23 {approx = true} : vector<16x1xf32> -> vector<16x1xf32>
    %27 = vector.broadcast %26 : vector<16x1xf32> to vector<16x8xf32>
    %28 = arith.mulf %25, %27 : vector<16x8xf32>
    %29 = arith.truncf %28 : vector<16x8xf32> to vector<16x8xbf16>
    %c0_12 = arith.constant 0 : index
    %c0_13 = arith.constant 0 : index
    %30 = vector.load %arg8[%c0_12, %c0_13] : memref<16x32xbf16, #tpu.memory_space<vmem>>, vector<16x8xbf16>
    tpu.vector_store %arg8[%c0_12, %c0_13], %29 {strides = array<i32>} : memref<16x32xbf16, #tpu.memory_space<vmem>>, vector<16x8xbf16>,
    %31 = vector.extract_strided_slice %12 {offsets = [0, 8], sizes = [16, 8], strides = [1, 1]} : vector<16x32xbf16> to vector<16x8xbf16>
    %c0_14 = arith.constant 0 : index
    %c8 = arith.constant 8 : index
    %32 = vector.load %arg7[%c0_14, %c8] : memref<16x64xbf16, #tpu.memory_space<vmem>>, vector<16x8xbf16>
    %c0_15 = arith.constant 0 : index
    %c40 = arith.constant 40 : index
    %33 = vector.load %arg7[%c0_15, %c40] : memref<16x64xbf16, #tpu.memory_space<vmem>>, vector<16x8xbf16>
    %cst_16 = arith.constant dense<0.000000e+00> : vector<16x16xf32>
    %34 = tpu.matmul %31, %32, %cst_16 {dimension_numbers = #tpu.dot_dimension_numbers<[1], [1], [0], [0], [0, 0, 1, 0], [], []>} : vector<16x8xbf16>, vector<16x8xbf16>, vector<16x16xf32> -> vector<16x16xf32>
    %cst_17 = arith.constant dense<0xFF800000> : vector<16xf32>
    %35 = vector.multi_reduction <maximumf>, %34, %cst_17 [1] : vector<16x16xf32> to vector<16xf32>
    %36 = vector.shape_cast %35 : vector<16xf32> to vector<16x1xf32>
    %37 = vector.broadcast %36 : vector<16x1xf32> to vector<16x16xf32>
    %38 = arith.subf %34, %37 : vector<16x16xf32>
    %39 = math.exp %38 : vector<16x16xf32>
    %cst_18 = arith.constant dense<0.000000e+00> : vector<16xf32>
    %40 = vector.multi_reduction <add>, %39, %cst_18 [1] : vector<16x16xf32> to vector<16xf32>
    %41 = vector.shape_cast %40 : vector<16xf32> to vector<16x1xf32>
    %42 = arith.truncf %39 : vector<16x16xf32> to vector<16x16xbf16>
    %cst_19 = arith.constant dense<0.000000e+00> : vector<16x8xf32>
    %43 = tpu.matmul %42, %33, %cst_19 {dimension_numbers = #tpu.dot_dimension_numbers<[1], [0], [0], [1], [0, 0, 1, 1], [], []>} : vector<16x16xbf16>, vector<16x8xbf16>, vector<16x8xf32> -> vector<16x8xf32>
    %44 = tpu.reciprocal %41 {approx = true} : vector<16x1xf32> -> vector<16x1xf32>
    %45 = vector.broadcast %44 : vector<16x1xf32> to vector<16x8xf32>
    %46 = arith.mulf %43, %45 : vector<16x8xf32>
    %47 = arith.truncf %46 : vector<16x8xf32> to vector<16x8xbf16>
    %c0_20 = arith.constant 0 : index
    %c8_21 = arith.constant 8 : index
    %48 = vector.load %arg8[%c0_20, %c8_21] : memref<16x32xbf16, #tpu.memory_space<vmem>>, vector<16x8xbf16>
    tpu.vector_store %arg8[%c0_20, %c8_21], %47 {strides = array<i32>} : memref<16x32xbf16, #tpu.memory_space<vmem>>, vector<16x8xbf16>,
    %49 = vector.extract_strided_slice %12 {offsets = [0, 16], sizes = [16, 8], strides = [1, 1]} : vector<16x32xbf16> to vector<16x8xbf16>
    %c0_22 = arith.constant 0 : index
    %c16 = arith.constant 16 : index
    %50 = vector.load %arg7[%c0_22, %c16] : memref<16x64xbf16, #tpu.memory_space<vmem>>, vector<16x8xbf16>
    %c0_23 = arith.constant 0 : index
    %c48 = arith.constant 48 : index
    %51 = vector.load %arg7[%c0_23, %c48] : memref<16x64xbf16, #tpu.memory_space<vmem>>, vector<16x8xbf16>
    %cst_24 = arith.constant dense<0.000000e+00> : vector<16x16xf32>
    %52 = tpu.matmul %49, %50, %cst_24 {dimension_numbers = #tpu.dot_dimension_numbers<[1], [1], [0], [0], [0, 0, 1, 0], [], []>} : vector<16x8xbf16>, vector<16x8xbf16>, vector<16x16xf32> -> vector<16x16xf32>
    %cst_25 = arith.constant dense<0xFF800000> : vector<16xf32>
    %53 = vector.multi_reduction <maximumf>, %52, %cst_25 [1] : vector<16x16xf32> to vector<16xf32>
    %54 = vector.shape_cast %53 : vector<16xf32> to vector<16x1xf32>
    %55 = vector.broadcast %54 : vector<16x1xf32> to vector<16x16xf32>
    %56 = arith.subf %52, %55 : vector<16x16xf32>
    %57 = math.exp %56 : vector<16x16xf32>
    %cst_26 = arith.constant dense<0.000000e+00> : vector<16xf32>
    %58 = vector.multi_reduction <add>, %57, %cst_26 [1] : vector<16x16xf32> to vector<16xf32>
    %59 = vector.shape_cast %58 : vector<16xf32> to vector<16x1xf32>
    %60 = arith.truncf %57 : vector<16x16xf32> to vector<16x16xbf16>
    %cst_27 = arith.constant dense<0.000000e+00> : vector<16x8xf32>
    %61 = tpu.matmul %60, %51, %cst_27 {dimension_numbers = #tpu.dot_dimension_numbers<[1], [0], [0], [1], [0, 0, 1, 1], [], []>} : vector<16x16xbf16>, vector<16x8xbf16>, vector<16x8xf32> -> vector<16x8xf32>
    %62 = tpu.reciprocal %59 {approx = true} : vector<16x1xf32> -> vector<16x1xf32>
    %63 = vector.broadcast %62 : vector<16x1xf32> to vector<16x8xf32>
    %64 = arith.mulf %61, %63 : vector<16x8xf32>
    %65 = arith.truncf %64 : vector<16x8xf32> to vector<16x8xbf16>
    %c0_28 = arith.constant 0 : index
    %c16_29 = arith.constant 16 : index
    %66 = vector.load %arg8[%c0_28, %c16_29] : memref<16x32xbf16, #tpu.memory_space<vmem>>, vector<16x8xbf16>
    tpu.vector_store %arg8[%c0_28, %c16_29], %65 {strides = array<i32>} : memref<16x32xbf16, #tpu.memory_space<vmem>>, vector<16x8xbf16>,
    %67 = vector.extract_strided_slice %12 {offsets = [0, 24], sizes = [16, 8], strides = [1, 1]} : vector<16x32xbf16> to vector<16x8xbf16>
    %c0_30 = arith.constant 0 : index
    %c24 = arith.constant 24 : index
    %68 = vector.load %arg7[%c0_30, %c24] : memref<16x64xbf16, #tpu.memory_space<vmem>>, vector<16x8xbf16>
    %c0_31 = arith.constant 0 : index
    %c56 = arith.constant 56 : index
    %69 = vector.load %arg7[%c0_31, %c56] : memref<16x64xbf16, #tpu.memory_space<vmem>>, vector<16x8xbf16>
    %cst_32 = arith.constant dense<0.000000e+00> : vector<16x16xf32>
    %70 = tpu.matmul %67, %68, %cst_32 {dimension_numbers = #tpu.dot_dimension_numbers<[1], [1], [0], [0], [0, 0, 1, 0], [], []>} : vector<16x8xbf16>, vector<16x8xbf16>, vector<16x16xf32> -> vector<16x16xf32>
    %cst_33 = arith.constant dense<0xFF800000> : vector<16xf32>
    %71 = vector.multi_reduction <maximumf>, %70, %cst_33 [1] : vector<16x16xf32> to vector<16xf32>
    %72 = vector.shape_cast %71 : vector<16xf32> to vector<16x1xf32>
    %73 = vector.broadcast %72 : vector<16x1xf32> to vector<16x16xf32>
    %74 = arith.subf %70, %73 : vector<16x16xf32>
    %75 = math.exp %74 : vector<16x16xf32>
    %cst_34 = arith.constant dense<0.000000e+00> : vector<16xf32>
    %76 = vector.multi_reduction <add>, %75, %cst_34 [1] : vector<16x16xf32> to vector<16xf32>
    %77 = vector.shape_cast %76 : vector<16xf32> to vector<16x1xf32>
    %78 = arith.truncf %75 : vector<16x16xf32> to vector<16x16xbf16>
    %cst_35 = arith.constant dense<0.000000e+00> : vector<16x8xf32>
    %79 = tpu.matmul %78, %69, %cst_35 {dimension_numbers = #tpu.dot_dimension_numbers<[1], [0], [0], [1], [0, 0, 1, 1], [], []>} : vector<16x16xbf16>, vector<16x8xbf16>, vector<16x8xf32> -> vector<16x8xf32>
    %80 = tpu.reciprocal %77 {approx = true} : vector<16x1xf32> -> vector<16x1xf32>
    %81 = vector.broadcast %80 : vector<16x1xf32> to vector<16x8xf32>
    %82 = arith.mulf %79, %81 : vector<16x8xf32>
    %83 = arith.truncf %82 : vector<16x8xf32> to vector<16x8xbf16>
    %c0_36 = arith.constant 0 : index
    %c24_37 = arith.constant 24 : index
    %84 = vector.load %arg8[%c0_36, %c24_37] : memref<16x32xbf16, #tpu.memory_space<vmem>>, vector<16x8xbf16>
    tpu.vector_store %arg8[%c0_36, %c24_37], %83 {strides = array<i32>} : memref<16x32xbf16, #tpu.memory_space<vmem>>, vector<16x8xbf16>,
    %c0_38 = arith.constant 0 : index
    %c0_39 = arith.constant 0 : index
    %85 = vector.load %arg8[%c0_38, %c0_39] : memref<16x32xbf16, #tpu.memory_space<vmem>>, vector<16x32xbf16>
    %c0_40 = arith.constant 0 : index
    %c0_41 = arith.constant 0 : index
    %86 = vector.load %arg4[%c0_40, %c0_41] : memref<32x32xbf16, #tpu.memory_space<vmem>>, vector<32x32xbf16>
    %cst_42 = arith.constant dense<0.000000e+00> : vector<16x32xf32>
    %87 = tpu.matmul %85, %86, %cst_42 {dimension_numbers = #tpu.dot_dimension_numbers<[1], [0], [0], [1], [0, 0, 1, 1], [], []>} : vector<16x32xbf16>, vector<32x32xbf16>, vector<16x32xf32> -> vector<16x32xf32>
    %c0_43 = arith.constant 0 : index
    %c0_44 = arith.constant 0 : index
    %88 = vector.load %arg5[%c0_43, %c0_44] : memref<1x32xf32, #tpu.memory_space<vmem>>, vector<1x32xf32>
    %89 = vector.broadcast %88 : vector<1x32xf32> to vector<16x32xf32>
    %90 = arith.addf %87, %89 : vector<16x32xf32>
    %c0_45 = arith.constant 0 : index
    %c0_46 = arith.constant 0 : index
    %c0_47 = arith.constant 0 : index
    %91 = vector.load %arg6[%c0_45, %c0_46, %c0_47] : memref<1x16x32xf32, #tpu.memory_space<vmem>>, vector<1x16x32xf32>
    %92 = vector.shape_cast %91 : vector<1x16x32xf32> to vector<16x32xf32>
    %93 = vector.shape_cast %90 : vector<16x32xf32> to vector<1x16x32xf32>
    tpu.vector_store %arg6[%c0_45, %c0_46, %c0_47], %93 {strides = array<i32>} : memref<1x16x32xf32, #tpu.memory_space<vmem>>, vector<1x16x32xf32>,
    return
  }
  func.func @transform_0(%arg0: i32, %arg1: i32) -> (i32, i32, i32) {
    %c0_i32 = arith.constant 0 : i32
    %c0_i32_0 = arith.constant 0 : i32
    %c0_i32_1 = arith.constant 0 : i32
    return %arg0, %c0_i32, %c0_i32_0 : i32, i32, i32
  }
  func.func @transform_1(%arg0: i32, %arg1: i32) -> (i32, i32) {
    %c0_i32 = arith.constant 0 : i32
    %c0_i32_0 = arith.constant 0 : i32
    %c0_i32_1 = arith.constant 0 : i32
    return %c0_i32, %c0_i32_0 : i32, i32
  }
  func.func @transform_2(%arg0: i32, %arg1: i32) -> (i32, i32) {
    %c0_i32 = arith.constant 0 : i32
    %c0_i32_0 = arith.constant 0 : i32
    %c0_i32_1 = arith.constant 0 : i32
    return %c0_i32, %c0_i32_0 : i32, i32
  }
  func.func @transform_3(%arg0: i32, %arg1: i32) -> (i32, i32) {
    %c0_i32 = arith.constant 0 : i32
    %c0_i32_0 = arith.constant 0 : i32
    %c0_i32_1 = arith.constant 0 : i32
    return %c0_i32, %c0_i32_0 : i32, i32
  }
  func.func @transform_4(%arg0: i32, %arg1: i32) -> (i32, i32, i32) {
    %c0_i32 = arith.constant 0 : i32
    %c0_i32_0 = arith.constant 0 : i32
    return %arg0, %arg1, %c0_i32 : i32, i32, i32
  }
}

</mosaic_0001>

<bundles_post_ra>
// kernel: tpu_custom_call.1
= control target key start
LH: loop header
LB: loop body
LE: loop exit
PB: predicated region body
PF: predicated region fallthrough
CT: control target
= control target key end

     0   :  { %9 = vsyncpa [#allocation5], 0  ;;  %s1963_s0 = inlined_call_operand.hbm [shape: bf16[4,16,32], index: 0, kind: input, shape index: {}]   ;;  %s1964_s1 = inlined_call_operand.hbm [shape: bf16[32,96], index: 1, kind: input, shape index: {}]   ;;  %s1965_s2 = inlined_call_operand.hbm [shape: bf16[32,32], index: 2, kind: input, shape index: {}]   ;;  %s1966_s3 = inlined_call_operand.vmem [shape: f32[1,32], index: 3, kind: input, shape index: {}]   ;;  %s1967_s4 = inlined_call_operand.hbm [shape: f32[4,16,32], index: 4, kind: output, shape index: {}]  }
   0x1   :  { %11 = vsyncpa [#allocation5 + $0x1], 0 }
   0x2   :  { %12 = vsyncpa [#allocation8], 0 }
   0x3   :  { %13 = vsyncpa [#allocation6], 0 }
   0x4   :  { %15 = vsyncpa [#allocation6 + $0x1], 0  ;;  %s1615_s15 = smov 0   ;;  %s1617_s16 = smov 0  }
   0x5   :  { %s1619_s17 = smov 0   ;;  %s1621_s18 = smov 0  }
   0x6   :  { %s1623_s19 = smov 0   ;;  %s1625_s20 = smov 0  }
   0x7 LB: > { %s1121_s21 = sadd.s32 4294967295, %s1569_s20   ;;  %s1122_s22 = sadd.s32 4294967294, %s1569_s20   ;;  %s1569_s20 = sphi %s1625_s20, %s21_s20   ;;  %s1565_s19 = sphi %s1623_s19, %s1989_s19   ;;  %s1561_s18 = sphi %s1621_s18, %s1988_s18   ;;  %s1557_s17 = sphi %s1619_s17, %s1987_s17   ;;  %s1553_s16 = sphi %s1617_s16, %s1986_s16   ;;  %s1549_s15 = sphi %s1615_s15, %s1985_s15  }
   0x8   : > { %p53_p0 = scmp.ne.s32.totalorder %s1553_s16, %s1549_s15  ;;  %p1649_p1 = scmp.eq.s32.totalorder %s1121_s21, 0 }
   0x9   : > { %p1653_p2 = scmp.eq.s32.totalorder %s1121_s21, 3  ;;  %p148_p3 = scmp.eq.s32.totalorder %s1122_s22, 3 }
   0xa   : > { %s1972_s23 = scalar_select %p1649_p1, 1, 0 }
   0xb   : > { %s1973_s24 = scalar_select %p1653_p2, 1, 0 }
   0xc   : > { %p1659_p4 = por %p1649_p1, %p53_p0  ;;  %p1123_p5 = scmp.ge.s32.totalorder %s1569_s20, 1 }
   0xd   : > { %p1664_p6 = por %p148_p3, %p53_p0  ;;  %p155_p7 = scmp.lt.s32.totalorder %s1569_s20, 5 }
   0xe   : > { %s1974_s25 = scalar_select %p1659_p4, 1, 0 }
   0xf   : > { %s1975_s26 = scalar_select %p1664_p6, 1, 0 }
  0x10   : > { %p1669_p8 = pnand %p1123_p5, %p155_p7  ;;  %s1571_s28 = smov [#allocation7]  }
  0x11   : > { %s167_s29 = sshll.u32 %s1571_s28, 4  ;;  %s1572_s5 = smov [#allocation9]   ;;  %s168_s29 = int_to_ptr.vmem [resolvable:$true] %s167_s29 }
  0x12   : > { %s1976_s27 = scalar_select %p1669_p8, 1, 0 }
  0x13   : > { %p1271_p9 = pneg %p1669_p8  ;;  %s180_s6 = sshll.u32 %s1572_s5, 4  ;;  %s1681_s6 = int_to_ptr.vmem [resolvable:$true] %s180_s6 }
  0x14   : > { %s1397_s9 = scalar_lea.hbm %s1964_s1, 256 }
  0x15   : > { %p1677_p10 = pnand %p1271_p9, %p1649_p1  ;;  %p1398_p11 = scmp.ne.s32.totalorder %s1964_s1, %s1397_s9 }
  0x16   : > { %p1404_p3 = scmp.lt.u32.totalorder %s1397_s9, %s1964_s1 }
  0x17   : > { %p1399_p12 = pneg %p1677_p10 }
  0x19   : > { %p1400_p13 = pnand %p1399_p12, %p1398_p11 }
  0x1b   : > { %p1401_p0 = pneg %p1400_p13 }
  0x1d   : > { %p1406_p5 = pnand %p1404_p3, %p1401_p0 }
  0x1f   : > { %1409 = shalt.err (!%p1406_p5)
}
  0x20   : > { %s1410_s14 = scalar_lea.vmem %s168_s29, 256  ;;  %p1418_p1 = scmp.lt.s32.totalorder %s168_s29, %s168_s29 }
  0x21   : > { %p1411_p7 = scmp.ne.s32.totalorder %s168_s29, %s1410_s14  ;;  %p1419_p4 = scmp.lt.s32.totalorder %s1410_s14, %s1410_s14 }
  0x23   : > { %p1413_p9 = pnand %p1411_p7, %p1399_p12  ;;  %p1420_p8 = por %p1419_p4, %p1418_p1 }
  0x25   : > { %p1414_p6 = pneg %p1413_p9 }
  0x27   : > { %p1421_p2 = pnand %p1420_p8, %p1414_p6 }
  0x29   : > { %1424 = shalt.err (!%p1421_p2)
}
  0x2a   : > { %s1573_s21 = smov 64   ;;  %s1574_s22 = smov 4  }
  0x2b   : > { %1274 = dma.hbm_to_vmem [thread:$0]  (!%p1677_p10), %s1964_s1, 256, %s168_s29, [#allocation8], %s1573_s21, %s1573_s21, %s1574_s22  }
  0x2c   : > { %s1425_s9 = scalar_lea.hbm %s1965_s2, 256 }
  0x2d   : > { %p1426_p1 = scmp.ne.s32.totalorder %s1965_s2, %s1425_s9  ;;  %p1432_p6 = scmp.lt.u32.totalorder %s1425_s9, %s1965_s2 }
  0x2f   : > { %p1428_p2 = pnand %p1426_p1, %p1399_p12 }
  0x31   : > { %p1429_p4 = pneg %p1428_p2 }
  0x33   : > { %p1434_p8 = pnand %p1432_p6, %p1429_p4 }
  0x35   : > { %1437 = shalt.err (!%p1434_p8)
}
  0x36   : > { %s1438_s29 = scalar_lea.vmem %s1681_s6, 256  ;;  %p1446_p3 = scmp.lt.s32.totalorder %s1681_s6, %s1681_s6 }
  0x37   : > { %p1439_p11 = scmp.ne.s32.totalorder %s1681_s6, %s1438_s29  ;;  %p1447_p5 = scmp.lt.s32.totalorder %s1438_s29, %s1438_s29 }
  0x39   : > { %p1441_p13 = pnand %p1439_p11, %p1399_p12  ;;  %p1448_p7 = por %p1447_p5, %p1446_p3 }
  0x3b   : > { %p1442_p0 = pneg %p1441_p13 }
  0x3d   : > { %p1449_p9 = pnand %p1448_p7, %p1442_p0 }
  0x3f   : > { %1452 = shalt.err (!%p1449_p9)
}
  0x40   : > { %1277 = dma.hbm_to_vmem [thread:$0]  (!%p1677_p10), %s1965_s2, 256, %s1681_s6, [#allocation8], %s1573_s21, %s1573_s21, %s1574_s22  }
  0x41   : > { %s33_s30 = sadd.s32 1, %s1565_s19  ;;  %s40_s5 = sadd.s32 1, %s1557_s17 }
  0x42   : > { %p35_p12 = scmp.ge.s32.totalorder %s33_s30, 4  ;;  %p47_p1 = scmp.ne.s32.totalorder %s1557_s17, %s1553_s16 }
  0x43   : > { %p48_p2 = scmp.eq.s32.totalorder %s1569_s20, 0  ;;  %p1288_p4 = scmp.lt.s32.totalorder %s1569_s20, 4 }
  0x44   : > { %s1991_s30 = smov (%p35_p12, %s33_s30), 0  ;;  %p1978_p8 = scmp.ne.s32.totalorder %s1973_s24, 0 }
  0x45   : > { %p49_p6 = por %p48_p2, %p47_p1  ;;  %s37_s8 = ssub.s32 %s1565_s19, %s1991_s30 }
  0x46   : > { %p1746_p11 = por %p1978_p8, %p47_p1  ;;  %s197_s9 = sand.u32 1, %s1557_s17  }
  0x47   : > { %p38_p13 = scmp.eq.s32.totalorder %s37_s8, 0  ;;  %s1127_s6 = sshll.u32 %s197_s9, 3 }
  0x48   : > { %s1160_s10 = sshll.u32 %s1565_s19, 7  ;;  %s201_s24 = scalar_lea.vmem [#allocation4], %s1127_s6 }
  0x49   : > { %s1755_s11 = scalar_select %p38_p13, %s1557_s17, %s40_s5  }
  0x4a   : > { %s1760_s29 = scalar_lea.hbm %s1963_s0, %s1160_s10  ;;  %s208_s14 = sshll.u32 %s201_s24, 4  ;;  %s1768_s14 = int_to_ptr.vmem [resolvable:$true] %s208_s14 }
  0x4b   : > { %p1764_p10 = pnand %p1288_p4, %p49_p6  ;;  %s1770_s5 = scalar_lea.sflag [#allocation5], %s197_s9 }
  0x4c   : > { %s1453_s8 = scalar_lea.hbm %s1760_s29, 128  ;;  %s1458_s12 = scalar_lea.hbm %s1963_s0, 512 }
  0x4d   : > { %p1454_p0 = scmp.ne.s32.totalorder %s1760_s29, %s1453_s8  ;;  %p1455_p3 = pneg %p1764_p10 }
  0x4e   : > { %p1459_p9 = scmp.lt.u32.totalorder %s1760_s29, %s1963_s0  ;;  %p1460_p12 = scmp.lt.u32.totalorder %s1458_s12, %s1453_s8 }
  0x4f   : > { %p1456_p5 = pnand %p1455_p3, %p1454_p0  ;;  %p1462_p2 = scmp.lt.u32.totalorder %s1453_s8, %s1760_s29 }
  0x50   : > { %p1461_p1 = por %p1460_p12, %p1459_p9 }
  0x51   : > { %p1457_p7 = pneg %p1456_p5 }
  0x52   : > { %p1463_p4 = por %p1462_p2, %p1461_p1 }
  0x54   : > { %p1464_p6 = pnand %p1463_p4, %p1457_p7 }
  0x56   : > { %1467 = shalt.err (!%p1464_p6)
}
  0x57   : > { %s1468_s9 = scalar_lea.vmem %s1768_s14, 128  ;;  %s1575_s6 = smov [#allocation4]  }
  0x58   : > { %p1469_p8 = scmp.ne.s32.totalorder %s1768_s14, %s1468_s9  ;;  %s1473_s10 = sshll.u32 %s1575_s6, 4  ;;  %s1474_s10 = int_to_ptr.vmem [resolvable:$false] %s1473_s10 }
  0x59   : > { %s1475_s13 = scalar_lea.vmem %s1474_s10, 256  ;;  %p1476_p5 = scmp.lt.s32.totalorder %s1768_s14, %s1474_s10 }
  0x5a   : > { %p1471_p13 = pnand %p1469_p8, %p1455_p3  ;;  %p1477_p9 = scmp.lt.s32.totalorder %s1475_s13, %s1468_s9 }
  0x5c   : > { %p1472_p0 = pneg %p1471_p13  ;;  %p1478_p12 = por %p1477_p9, %p1476_p5 }
  0x5e   : > { %p1479_p1 = pnand %p1478_p12, %p1472_p0 }
  0x60   : > { %1482 = shalt.err (!%p1479_p1)
}
  0x61   : > { %1281 = dma.hbm_to_vmem [thread:$0]  (!%p1764_p10), %s1760_s29, 128, %s1768_s14, %s1770_s5, %s1573_s21, %s1573_s21, %s1574_s22  }
  0x62   : > { %p1981_p3 = scmp.ne.s32.totalorder %s1976_s27, 0 }
  0x63   : > { %s1804_s8 = sand.u32 (!%p1981_p3), 1, %s1553_s16   ;;  %p1982_p7 = scmp.ne.s32.totalorder (!%p1981_p3), %s1974_s25, 0 }
  0x64   : > { %220 = sbr.rel (%p1981_p3) target bundleno = 1551 (0x60f), region = 36  ;;  %s1131_s12 = sshll.u32 (!%p1981_p3), %s1804_s8, 3 }
  0x65   : > { %s223_s24 = scalar_lea.sflag (!%p1981_p3), [#allocation5], %s1804_s8  ;;  %s226_s9 = scalar_lea.vmem (!%p1981_p3), [#allocation4], %s1131_s12 }
  0x6b   : > { %1536 = dma.done.wait (%p1982_p7), %s223_s24, 128  }
  0x6c   : > { %1538 = vsyncadd (%p1982_p7), %s223_s24, 4294967168  ;;  %p1983_p2 = scmp.ne.s32.totalorder %s1972_s23, 0 }
  0x6e   : > { %1540 = dma.done.wait (%p1983_p2), [#allocation8], 512  }
  0x6f   : > { %1542 = vsyncadd (%p1983_p2), [#allocation8], 4294966784  ;;  %v1576_v0 = vmov 0.0   ;;  %vm1577_vm0 = vmmov 0   ;;  %v1357_v1 = vld [vmem:[#allocation7] sm:$0xff]   ;;  %s1578_s25 = smov 96  }
  0x70   : > { %1187 = vmatprep.subr.bf16.mxu0 %v1576_v0  ;;  %1191 = vmatprep.mubr.msk.bf16.mxu0 %vm1577_vm0, %v1576_v0  ;;  %v1358_v2 = vld [vmem:[#allocation7 + $0x8] sm:$0xff]   ;;  %v1360_v3 = vld [vmem:[#allocation7] sm:$0xff]   ;;  %v1362_v5 = vld [vmem:[%s226_s9] sm:$0xff]   ;;  %vm292_vm1 = vcmask 261120   ;;  %vm338_vm2 = vcmask 523264   ;;  %vm417_vm3 = vcmask 64512  }
  0x71   : > { %1195 = vmatprep.subr.bf16.mxu1 %v1576_v0  ;;  %1199 = vmatprep.mubr.msk.bf16.mxu1 %vm1577_vm0, %v1576_v0  ;;  %v1361_v4 = vld [vmem:[#allocation7 + $0x8] sm:$0xff]   ;;  %v1359_v8 = vld [vmem:[%s226_s9] sm:$0xff]   ;;  %s1579_s23 = smov 112   ;;  %s1580_s27 = smov 120   ;;  %vm465_vm4 = vcmask 130048   ;;  %vm668_vm5 = vcmask 130112  }
  0x72   : > { %286 = vrot.lane.b32.xlu0 %v1357_v1, %s1578_s25  ;;  %1196 = vmatpush3.bf16.msra.mxu1 %v1360_v3  ;;  %s1581_s21 = smov 104   ;;  %s1582_s22 = smov 80   ;;  %vm798_vm6 = vcmask 195712   ;;  %vm928_vm7 = vcmask 261312  }
  0x73   : > { %1197 = vmatprep.subr.bf16.mxu1 %v1576_v0  ;;  %s1583_s29 = smov 72   ;;  %s1584_s14 = smov 88  }
  0x74   : > { %s1585_s28 = smov 8   ;;  %s1586_s5 = smov 16  }
  0x75   : > { %s1587_s6 = smov 24   ;;  %s1134_s10 = sshll.u32 %s1804_s8, 4 }
  0x76   : > { %288 = vrot.lane.b32.xlu0 %v1358_v2, %s1578_s25  ;;  %1198 = vmatpush3.bf16.msra.mxu1 %v1361_v4  ;;  %s258_s24 = scalar_lea.vmem [#allocation10], %s1134_s10 }
  0x77   : > { %1209 = vmatprep.subr.bf16.mxu1 %v1576_v0  ;;  %s1016_s9 = sshll.u32 %s258_s24, 4  ;;  %s1907_s9 = int_to_ptr.vmem [resolvable:$true] %s1016_s9 }
  0x79   : > { %1200 = vmatmul.mubr.msk.bf16.vlgmr.msra.gmra.mrb[0].mxu1 %vm292_vm1, %v1362_v5 }
  0x7a   : > { %1211 = vmatprep.mubr.msk.bf16.mxu1 %vm1577_vm0, %v1576_v0 }
  0xe4   : > { %v287_v6 = vpop.permute.xlu0 %286 }
  0xe5   : > { %1188 = vmatpush3.bf16.msra.mxu0 %v287_v6 }
  0xe6   : > { %1189 = vmatprep.subr.bf16.mxu0 %v1576_v0 }
  0xe8   : > { %v289_v7 = vpop.permute.xlu0 %288 }
  0xe9   : > { %1190 = vmatpush3.bf16.msra.mxu0 %v289_v7 }
  0xea   : > { %1203 = vmatprep.subr.bf16.mxu0 %v1576_v0 }
  0xec   : > { %1192 = vmatmul.mubr.msk.bf16.vlgmr.msra.gmra.mrb[0].mxu0 %vm292_vm1, %v1359_v8 }
  0xed   : > { %1205 = vmatprep.mubr.msk.bf16.mxu0 %vm1577_vm0, %v1576_v0 }
 0x14c   : > { %v406_v9 = vpop.f32.mrb[0].mxu1 }
 0x14d   : > { %v413_v10 = vmul.f32 0.35355338, %v406_v9  ;;  %v1201_v11 = vpop.f32.mrb[1].mxu1 }
 0x14e   : > { %v409_v12 = vpop.f32.mrb[2].mxu1 }
 0x14f   : > { %v414_v13 = vmul.f32 0.35355338, %v409_v12  ;;  %v1202_v14 = vpop.f32.mrb[3].mxu1 }
 0x151   : > { %v415_v15 = vpack.c.bf16 %v414_v13, %v413_v10 }
 0x1bf   : > { %v330_v16 = vpop.f32.mrb[0].mxu0 }
 0x1c0   : > { %v1193_v17 = vpop.f32.mrb[1].mxu0 }
 0x1c1   : > { %v333_v18 = vpop.f32.mrb[2].mxu0 }
 0x1c2   : > { %v337_v19 = vpack.c.bf16 %v333_v18, %v330_v16  ;;  %v1194_v20 = vpop.f32.mrb[3].mxu0 }
 0x1c4   : > { %339 = vst.msk [vmem:[#allocation2] sm:$0xff] %vm338_vm2, %v337_v19 }
 0x1cb   : > { %v1834_v21 = vld [vmem:[#allocation2] sm:$0xff] }
 0x1cc   : > { %674 = vrot.lane.b32.xlu0 %v1834_v21, %s1579_s23  ;;  %544 = vrot.lane.b32.xlu1 %v1834_v21, %s1580_s27  ;;  %v422_v22 = vsel %vm417_vm3, %v1834_v21, 0 }
 0x1cd   : > { %1204 = vmatpush3.bf16.xpose.msra.mxu0 %v422_v22 }
 0x1ce   : > { %1215 = vmatprep.subr.bf16.mxu0 %v1576_v0 }
 0x1d0   : > { %804 = vrot.lane.b32.xlu0 %v1834_v21, %s1581_s21  ;;  %541 = vrot.lane.b32.xlu1 %v415_v15, %s1580_s27 }
 0x1d4   : > { %671 = vrot.lane.b32.xlu1 %v415_v15, %s1579_s23  ;;  %1206 = vmatmul.mubr.msk.bf16.vlgmr.msra.gmra.mrb[4].mxu0 %vm417_vm3, %v415_v15 }
 0x1d5   : > { %1217 = vmatprep.mubr.msk.bf16.mxu0 %vm1577_vm0, %v1576_v0 }
 0x1d8   : > { %801 = vrot.lane.b32.xlu1 %v415_v15, %s1581_s21 }
 0x1dc   : > { %486 = vrot.lane.b32.xlu1 %v1834_v21, %s1578_s25  ;;  %s1161_s25 = sshll.u32 %s1561_s18, 8  ;;  %s1001_s18 = scalar_lea.sflag [#allocation6], %s1804_s8 }
 0x1dd   : > { %s1913_s21 = scalar_lea.hbm %s1967_s4, %s1161_s25 }
 0x23e   : > { %v545_v23 = vpop.permute.xlu1 %544  ;;  %v675_v26 = vpop.permute.xlu0 %674 }
 0x23f   : > { %v550_v24 = vsel %vm417_vm3, %v545_v23, 0  ;;  %v680_v28 = vsel %vm417_vm3, %v675_v26, 0 }
 0x240   : > { %1216 = vmatpush3.bf16.xpose.msra.mxu0 %v550_v24 }
 0x241   : > { %1227 = vmatprep.subr.bf16.mxu0 %v1576_v0 }
 0x242   : > { %v542_v25 = vpop.permute.xlu1 %541  ;;  %v805_v30 = vpop.permute.xlu0 %804 }
 0x243   : > { %v810_v32 = vsel %vm417_vm3, %v805_v30, 0 }
 0x246   : > { %v672_v27 = vpop.permute.xlu1 %671 }
 0x247   : > { %1218 = vmatmul.mubr.msk.bf16.vlgmr.msra.gmra.mrb[8].mxu0 %vm417_vm3, %v542_v25 }
 0x248   : > { %1228 = vmatpush3.bf16.xpose.msra.mxu0 %v680_v28  ;;  %1229 = vmatprep.mubr.msk.bf16.mxu0 %vm1577_vm0, %v1576_v0 }
 0x249   : > { %1239 = vmatprep.subr.bf16.mxu0 %v1576_v0 }
 0x24a   : > { %v802_v29 = vpop.permute.xlu1 %801 }
 0x24e   : > { %v487_v31 = vpop.permute.xlu1 %486 }
 0x24f   : > { %1210 = vmatpush3.bf16.msra.mxu1 %v487_v31  ;;  %1230 = vmatmul.mubr.msk.bf16.vlgmr.msra.gmra.mrb[12].mxu0 %vm417_vm3, %v672_v27 }
 0x250   : > { %1240 = vmatpush3.bf16.xpose.msra.mxu0 %v810_v32  ;;  %1241 = vmatprep.mubr.msk.bf16.mxu0 %vm1577_vm0, %v1576_v0 }
 0x251   : > { %1221 = vmatprep.subr.bf16.mxu1 %v1576_v0  ;;  %1251 = vmatprep.subr.bf16.mxu0 %v1576_v0 }
 0x257   : > { %1242 = vmatmul.mubr.msk.bf16.vlgmr.msra.gmra.mrb[16].mxu0 %vm417_vm3, %v802_v29 }
 0x258   : > { %1255 = vmatprep.mubr.msk.bf16.mxu0 %vm1577_vm0, %v1576_v0 }
 0x2a7   : > { %v458_v33 = vpop.f32.mrb[4].mxu0 }
 0x2a8   : > { %v1207_v34 = vpop.f32.mrb[5].mxu0  ;;  %v466_v35 = vsel %vm465_vm4, %v458_v33, -inf }
 0x2a9   : > { %467 = vmax.xlane.f32.xlu0 %v466_v35  ;;  %v461_v36 = vpop.f32.mrb[6].mxu0 }
 0x2aa   : > { %v1208_v37 = vpop.f32.mrb[7].mxu0  ;;  %v469_v38 = vsel %vm465_vm4, %v461_v36, -inf }
 0x2ab   : > { %470 = vmax.xlane.f32.xlu1 %v469_v38 }
 0x31a   : > { %v586_v39 = vpop.f32.mrb[8].mxu0 }
 0x31b   : > { %v1219_v40 = vpop.f32.mrb[9].mxu0  ;;  %v593_v41 = vsel %vm465_vm4, %v586_v39, -inf }
 0x31c   : > { %594 = vmax.xlane.f32.xlu0 %v593_v41  ;;  %v589_v42 = vpop.f32.mrb[10].mxu0 }
 0x31d   : > { %v1220_v43 = vpop.f32.mrb[11].mxu0  ;;  %v596_v44 = vsel %vm465_vm4, %v589_v42, -inf }
 0x320   : > { %597 = vmax.xlane.f32.xlu0 %v596_v44 }
 0x322   : > { %v716_v45 = vpop.f32.mrb[12].mxu0 }
 0x323   : > { %v1231_v46 = vpop.f32.mrb[13].mxu0  ;;  %v723_v47 = vsel %vm465_vm4, %v716_v45, -inf }
 0x324   : > { %724 = vmax.xlane.f32.xlu1 %v723_v47  ;;  %v719_v48 = vpop.f32.mrb[14].mxu0 }
 0x325   : > { %v1232_v49 = vpop.f32.mrb[15].mxu0  ;;  %v726_v50 = vsel %vm465_vm4, %v719_v48, -inf }
 0x326   : > { %727 = vmax.xlane.f32.xlu0 %v726_v50 }
 0x32a   : > { %v846_v51 = vpop.f32.mrb[16].mxu0 }
 0x32b   : > { %v1243_v52 = vpop.f32.mrb[17].mxu0  ;;  %v853_v53 = vsel %vm465_vm4, %v846_v51, -inf }
 0x32c   : > { %854 = vmax.xlane.f32.xlu1 %v853_v53  ;;  %v849_v54 = vpop.f32.mrb[18].mxu0 }
 0x32d   : > { %v1244_v55 = vpop.f32.mrb[19].mxu0  ;;  %v856_v56 = vsel %vm465_vm4, %v849_v54, -inf }
 0x32e   : > { %857 = vmax.xlane.f32.xlu0 %v856_v56 }
 0x336   : > { %v468_v57 = vpop.xlane.xlu0 %467 }
 0x337   : > { %v472_v58 = vsub.f32 %v458_v33, %v468_v57 }
 0x338   : > { %v471_v59 = vpop.xlane.xlu1 %470 }
 0x339   : > { %v474_v60 = vmul.f32 1.442695, %v472_v58  ;;  %v473_v61 = vsub.f32 %v461_v36, %v471_v59 }
 0x33b   : > { %v476_v62 = vmul.f32 1.442695, %v473_v61  ;;  %1365 = vpow2.f32 %v474_v60 }
 0x33d   : > { %1367 = vpow2.f32 %v476_v62  ;;  %742 = vrot.lane.b32.xlu1 %v1834_v21, %s1582_s22  ;;  %s1483_s22 = scalar_lea.vmem %s1907_s9, 256 }
 0x33e   : > { %p1484_p10 = scmp.ne.s32.totalorder %s1907_s9, %s1483_s22 }
 0x340   : > { %p1485_p4 = pnand %p1484_p10, %p1746_p11 }
 0x341   : > { %872 = vrot.lane.b32.xlu1 %v1834_v21, %s1583_s29  ;;  %s1588_s29 = smov [#allocation10]  }
 0x342   : > { %p1486_p6 = pneg %p1485_p4 }
 0x344   : > { %612 = vrot.lane.b32.xlu0 %v1834_v21, %s1584_s14  ;;  %s1487_s14 = sshll.u32 %s1588_s29, 4  ;;  %s1488_s14 = int_to_ptr.vmem [resolvable:$false] %s1487_s14 }
 0x345   : > { %v1366_v63 = vpop.eup %1365  ;;  %p1490_p8 = scmp.lt.s32.totalorder %s1907_s9, %s1488_s14 }
 0x347   : > { %v1874_v1 = vpop.eup %1367 }
 0x348   : > { %v484_v2 = vpack.c.bf16 %v1874_v1, %v1366_v63  ;;  %v481_v40 = vsel %vm465_vm4, %v1874_v1, 0.0 }
 0x34a   : > { %1212 = vmatmul.mubr.msk.bf16.vlgmr.msra.gmra.mrb[4].mxu1 %vm465_vm4, %v484_v2 }
 0x34b   : > { %1223 = vmatprep.mubr.msk.bf16.mxu1 %vm1577_vm0, %v1576_v0 }
 0x3a9   : > { %v595_v3 = vpop.xlane.xlu0 %594 }
 0x3aa   : > { %v599_v4 = vsub.f32 %v586_v39, %v595_v3  ;;  %v478_v39 = vsel %vm465_vm4, %v1366_v63, 0.0 }
 0x3ac   : > { %v601_v5 = vmul.f32 1.442695, %v599_v4 }
 0x3ad   : > { %v598_v6 = vpop.xlane.xlu0 %597 }
 0x3ae   : > { %1369 = vpow2.f32 %v601_v5  ;;  %v600_v7 = vsub.f32 %v589_v42, %v598_v6 }
 0x3b0   : > { %v603_v8 = vmul.f32 1.442695, %v600_v7 }
 0x3b1   : > { %v725_v9 = vpop.xlane.xlu1 %724 }
 0x3b2   : > { %1371 = vpow2.f32 %v603_v8  ;;  %v729_v10 = vsub.f32 %v716_v45, %v725_v9 }
 0x3b3   : > { %v728_v11 = vpop.xlane.xlu0 %727 }
 0x3b4   : > { %v731_v12 = vmul.f32 1.442695, %v729_v10  ;;  %v730_v13 = vsub.f32 %v719_v48, %v728_v11  ;;  %v1363_v10 = vld [vmem:[#allocation9] sm:$0xff]  }
 0x3b5   : > { %1252 = vmatpush3.bf16.msra.mxu0 %v1363_v10 }
 0x3b6   : > { %1373 = vpow2.f32 %v731_v12  ;;  %v733_v14 = vmul.f32 1.442695, %v730_v13  ;;  %v1364_v13 = vld [vmem:[#allocation9 + $0x8] sm:$0xff]   ;;  %1253 = vmatprep.subr.bf16.mxu0 %v1576_v0 }
 0x3b8   : > { %v1370_v15 = vpop.eup %1369  ;;  %1375 = vpow2.f32 %v733_v14 }
 0x3b9   : > { %v855_v16 = vpop.xlane.xlu1 %854  ;;  %v605_v17 = vsel %vm465_vm4, %v1370_v15, 0.0  ;;  %1254 = vmatpush3.bf16.msra.mxu0 %v1364_v13 }
 0x3ba   : > { %v859_v18 = vsub.f32 %v846_v51, %v855_v16  ;;  %606 = vadd.xlane.f32.xlu0 %v605_v17 }
 0x3bb   : > { %v858_v19 = vpop.xlane.xlu0 %857 }
 0x3bc   : > { %v1372_v20 = vpop.eup %1371  ;;  %v861_v21 = vmul.f32 1.442695, %v859_v18  ;;  %v860_v22 = vsub.f32 %v849_v54, %v858_v19 }
 0x3bd   : > { %v608_v23 = vsel %vm465_vm4, %v1372_v20, 0.0  ;;  %v611_v24 = vpack.c.bf16 %v1372_v20, %v1370_v15  ;;  %v743_v30 = vpop.permute.xlu1 %742 }
 0x3be   : > { %1377 = vpow2.f32 %v861_v21  ;;  %v863_v25 = vmul.f32 1.442695, %v860_v22  ;;  %609 = vadd.xlane.f32.xlu1 %v608_v23 }
 0x3bf   : > { %v613_v26 = vpop.permute.xlu0 %612 }
 0x3c0   : > { %v1374_v27 = vpop.eup %1373  ;;  %1379 = vpow2.f32 %v863_v25  ;;  %1222 = vmatpush3.bf16.msra.mxu1 %v613_v26 }
 0x3c1   : > { %v735_v28 = vsel %vm465_vm4, %v1374_v27, 0.0  ;;  %1233 = vmatprep.subr.bf16.mxu1 %v1576_v0  ;;  %v873_v36 = vpop.permute.xlu1 %872 }
 0x3c2   : > { %v1376_v29 = vpop.eup %1375  ;;  %736 = vadd.xlane.f32.xlu0 %v735_v28 }
 0x3c3   : > { %1224 = vmatmul.mubr.msk.bf16.vlgmr.msra.gmra.mrb[8].mxu1 %vm465_vm4, %v611_v24  ;;  %v741_v31 = vpack.c.bf16 %v1376_v29, %v1374_v27  ;;  %v738_v32 = vsel %vm465_vm4, %v1376_v29, 0.0  ;;  %v1151_v27 = vld [vmem:[%s1966_s3] ss:$0 sm:$0xff] }
 0x3c4   : > { %1234 = vmatpush3.bf16.msra.mxu1 %v743_v30  ;;  %1235 = vmatprep.mubr.msk.bf16.mxu1 %vm1577_vm0, %v1576_v0 }
 0x3c5   : > { %1245 = vmatprep.subr.bf16.mxu1 %v1576_v0 }
 0x3c6   : > { %739 = vadd.xlane.f32.xlu0 %v738_v32 }
 0x3c8   : > { %v1378_v33 = vpop.eup %1377 }
 0x3c9   : > { %v865_v34 = vsel %vm465_vm4, %v1378_v33, 0.0 }
 0x3ca   : > { %v1380_v35 = vpop.eup %1379  ;;  %866 = vadd.xlane.f32.xlu1 %v865_v34 }
 0x3cb   : > { %1236 = vmatmul.mubr.msk.bf16.vlgmr.msra.gmra.mrb[12].mxu1 %vm465_vm4, %v741_v31  ;;  %v868_v37 = vsel %vm465_vm4, %v1380_v35, 0.0  ;;  %v871_v38 = vpack.c.bf16 %v1380_v35, %v1378_v33 }
 0x3cc   : > { %1246 = vmatpush3.bf16.msra.mxu1 %v873_v36  ;;  %869 = vadd.xlane.f32.xlu0 %v868_v37 }
 0x3cd   : > { %1247 = vmatprep.mubr.msk.bf16.mxu1 %vm1577_vm0, %v1576_v0 }
 0x3ce   : > { %479 = vadd.xlane.f32.xlu1 %v478_v39 }
 0x3d0   : > { %482 = vadd.xlane.f32.xlu0 %v481_v40 }
 0x3d3   : > { %1248 = vmatmul.mubr.msk.bf16.vlgmr.msra.gmra.mrb[16].mxu1 %vm465_vm4, %v871_v38 }
 0x41d   : > { %v526_v41 = vpop.f32.mrb[4].mxu1 }
 0x41e   : > { %v1213_v42 = vpop.f32.mrb[5].mxu1 }
 0x41f   : > { %v529_v43 = vpop.f32.mrb[6].mxu1 }
 0x420   : > { %v1214_v44 = vpop.f32.mrb[7].mxu1 }
 0x447   : > { %v607_v45 = vpop.xlane.xlu0 %606 }
 0x44b   : > { %v610_v47 = vpop.xlane.xlu1 %609 }
 0x44f   : > { %v737_v46 = vpop.xlane.xlu0 %736 }
 0x453   : > { %v740_v48 = vpop.xlane.xlu0 %739 }
 0x457   : > { %v867_v49 = vpop.xlane.xlu1 %866 }
 0x459   : > { %v870_v50 = vpop.xlane.xlu0 %869 }
 0x45b   : > { %v480_v51 = vpop.xlane.xlu1 %479 }
 0x45c   : > { %1381 = vrcp.f32 %v480_v51 }
 0x45d   : > { %v483_v52 = vpop.xlane.xlu0 %482 }
 0x45e   : > { %1383 = vrcp.f32 %v483_v52 }
 0x45f   : > { %1385 = vrcp.f32 %v607_v45 }
 0x460   : > { %1387 = vrcp.f32 %v610_v47 }
 0x461   : > { %1389 = vrcp.f32 %v737_v46 }
 0x462   : > { %1391 = vrcp.f32 %v740_v48 }
 0x463   : > { %1393 = vrcp.f32 %v867_v49 }
 0x464   : > { %1395 = vrcp.f32 %v870_v50 }
 0x466   : > { %v1382_v53 = vpop.eup %1381 }
 0x467   : > { %v535_v55 = vmul.f32 %v1382_v53, %v526_v41 }
 0x468   : > { %v1384_v54 = vpop.eup %1383 }
 0x469   : > { %v536_v56 = vmul.f32 %v1384_v54, %v529_v43  ;;  %v1386_v58 = vpop.eup %1385 }
 0x46a   : > { %v1388_v62 = vpop.eup %1387 }
 0x46b   : > { %v537_v57 = vpack.c.bf16 %v536_v56, %v535_v55  ;;  %v1390_v4 = vpop.eup %1389 }
 0x46c   : > { %v1392_v8 = vpop.eup %1391 }
 0x46d   : > { %538 = vst.msk [vmem:[#allocation3] sm:$0xff] %vm417_vm3, %v537_v57  ;;  %v1394_v15 = vpop.eup %1393 }
 0x46e   : > { %v1396_v19 = vpop.eup %1395 }
 0x496   : > { %v652_v59 = vpop.f32.mrb[8].mxu1 }
 0x497   : > { %v661_v60 = vmul.f32 %v1386_v58, %v652_v59  ;;  %v1225_v61 = vpop.f32.mrb[9].mxu1 }
 0x498   : > { %v655_v63 = vpop.f32.mrb[10].mxu1 }
 0x499   : > { %v662_v1 = vmul.f32 %v1388_v62, %v655_v63  ;;  %v1226_v2 = vpop.f32.mrb[11].mxu1 }
 0x49b   : > { %v663_v3 = vpack.c.bf16 %v662_v1, %v661_v60 }
 0x49d   : > { %665 = vrot.lane.b32.xlu1 %v663_v3, %s1585_s28 }
 0x49e   : > { %v782_v5 = vpop.f32.mrb[12].mxu1 }
 0x49f   : > { %v791_v6 = vmul.f32 %v1390_v4, %v782_v5  ;;  %v1237_v7 = vpop.f32.mrb[13].mxu1 }
 0x4a0   : > { %v785_v9 = vpop.f32.mrb[14].mxu1 }
 0x4a1   : > { %v792_v11 = vmul.f32 %v1392_v8, %v785_v9  ;;  %v1238_v12 = vpop.f32.mrb[15].mxu1 }
 0x4a3   : > { %v793_v14 = vpack.c.bf16 %v792_v11, %v791_v6 }
 0x4a5   : > { %795 = vrot.lane.b32.xlu0 %v793_v14, %s1586_s5  ;;  %s1489_s5 = scalar_lea.vmem %s1488_s14, 512 }
 0x4a6   : > { %v912_v16 = vpop.f32.mrb[16].mxu1  ;;  %p1491_p13 = scmp.lt.s32.totalorder %s1489_s5, %s1483_s22 }
 0x4a7   : > { %v921_v17 = vmul.f32 %v1394_v15, %v912_v16  ;;  %v1249_v18 = vpop.f32.mrb[17].mxu1 }
 0x4a8   : > { %v915_v20 = vpop.f32.mrb[18].mxu1  ;;  %p1492_p0 = por %p1491_p13, %p1490_p8 }
 0x4a9   : > { %v922_v21 = vmul.f32 %v1396_v19, %v915_v20  ;;  %v1250_v22 = vpop.f32.mrb[19].mxu1 }
 0x4aa   : > { %p1493_p5 = pnand %p1492_p0, %p1486_p6 }
 0x4ab   : > { %v923_v23 = vpack.c.bf16 %v922_v21, %v921_v17 }
 0x4ad   : > { %925 = vrot.lane.b32.xlu1 %v923_v23, %s1587_s6 }
 0x50f   : > { %v666_v24 = vpop.permute.xlu1 %665 }
 0x510   : > { %669 = vst.msk [vmem:[#allocation3] sm:$0xff] %vm668_vm5, %v666_v24 }
 0x517   : > { %v796_v0 = vpop.permute.xlu0 %795 }
 0x518   : > { %799 = vst.msk [vmem:[#allocation3] sm:$0xff] %vm798_vm6, %v796_v0 }
 0x51f   : > { %v926_v25 = vpop.permute.xlu1 %925 }
 0x520   : > { %929 = vst.msk [vmem:[#allocation3] sm:$0xff] %vm928_vm7, %v926_v25 }
 0x527   : > { %v930_v26 = vld [vmem:[#allocation3] sm:$0xff] }
 0x528   : > { %1256 = vmatmul.mubr.msk.bf16.vlgmr.msra.gmra.mrb[20].mxu0 %vm292_vm1, %v930_v26 }
 0x5fb   : > { %v991_v28 = vpop.f32.mrb[20].mxu0 }
 0x5fc   : > { %v992_v29 = vadd.f32 %v1151_v27, %v991_v28  ;;  %v1257_v30 = vpop.f32.mrb[21].mxu0 }
 0x5fd   : > { %v994_v31 = vpop.f32.mrb[22].mxu0 }
 0x5fe   : > { %998 = vst.msk [vmem:[%s258_s24] sm:$0xff] %vm292_vm1, %v992_v29  ;;  %v995_v32 = vadd.f32 %v1151_v27, %v994_v31  ;;  %v1258_v33 = vpop.f32.mrb[23].mxu0 }
 0x600   : > { %999 = vst.msk [vmem:[%s258_s24 + $0x8] sm:$0xff] %vm292_vm1, %v995_v32 }
 0x601   : > { %1496 = shalt.err (!%p1493_p5)
}
 0x602   : > { %s1497_s6 = scalar_lea.hbm %s1913_s21, 256  ;;  %s1501_s12 = scalar_lea.hbm %s1967_s4, 1024 }
 0x603   : > { %p1498_p9 = scmp.ne.s32.totalorder %s1913_s21, %s1497_s6  ;;  %p1502_p3 = scmp.lt.u32.totalorder %s1913_s21, %s1967_s4 }
 0x604   : > { %p1503_p7 = scmp.lt.u32.totalorder %s1501_s12, %s1497_s6  ;;  %p1505_p10 = scmp.lt.u32.totalorder %s1497_s6, %s1913_s21 }
 0x605   : > { %p1499_p12 = pnand %p1498_p9, %p1746_p11 }
 0x606   : > { %p1504_p2 = por %p1503_p7, %p1502_p3 }
 0x607   : > { %p1500_p1 = pneg %p1499_p12 }
 0x608   : > { %p1506_p4 = por %p1505_p10, %p1504_p2 }
 0x60a   : > { %p1507_p6 = pnand %p1506_p4, %p1500_p1 }
 0x60c   : > { %1510 = shalt.err (!%p1507_p6)
}
 0x60d   : > { %s1589_s23 = smov 128  }
 0x60e   : > { %1269 = dma.vmem_to_hbm [thread:$0]  (%p1746_p11), %s1907_s9, 256, %s1913_s21, %s1001_s18, %s1589_s23, %s1589_s23, %s1585_s28  }
 0x60f PF: > { %p1291_p8 = scmp.ge.s32.totalorder %s1569_s20, 2  ;;  %s1031_s27 = sand.u32 1, %s1549_s15  }
 0x610   : > { %p1984_p13 = scmp.ne.s32.totalorder %s1975_s26, 0  ;;  %s1032_s22 = scalar_lea.sflag [#allocation6], %s1031_s27 }
 0x612   : > { %p1283_p0 = pnand %p1291_p8, %p1984_p13 }
 0x614   : > { %1544 = dma.done.wait (!%p1283_p0), %s1032_s22, 256  }
 0x615   : > { %1546 = vsyncadd (!%p1283_p0), %s1032_s22, 4294967040  ;;  %s21_s20 = sadd.s32 1, %s1569_s20   ;;  %s1985_s15 = smov %s1553_s16 }
 0x616   : > { %p18_p5 = scmp.ge.s32.totalorder %s21_s20, 6   ;;  %s1986_s16 = smov %s1557_s17 }
 0x617   : > { %s1987_s17 = smov %s1755_s11  ;;  %s1988_s18 = smov %s1565_s19 }
 0x618   : > { %s1989_s19 = smov %s1991_s30  ;;  %20 = sbr.rel (!%p18_p5) target bundleno = 7 (0x7), region = 94 }
 0x61f   :  { %1037 = vsyncpa [#allocation5], 1 }
 0x620   :  { %1039 = vsyncpa [#allocation5 + $0x1], 1 }
 0x621   :  { %1040 = vsyncpa [#allocation8], 1 }
 0x622   :  { %1041 = vsyncpa [#allocation6], 1 }
 0x623   :  { %1043 = vsyncpa [#allocation6 + $0x1], 1 }

</bundles_post_ra>
